<compile_context>
chip_gen: v7x
topology: tpu7x:2x2x1
jax: 0.10.0
libtpu: 0.0.40
codegen_flags: <defaults>
</compile_context>

<pallas_src>
import jax
import jax.numpy as jnp
from jax.experimental import pallas as pl
from jax.experimental.pallas import tpu as pltpu

_LANE = 128             # vreg lane width
_SUBLANE = 8            # f32 / int32 sublane tile
_MAX_BLOCK_ROWS = 8192  # 8192x128x4B = 4 MiB/buffer; int32-in + f32-out,
                        # double-buffered -> ~16 MiB, inside 32 MiB scoped VMEM

_COMPILER_PARAMS = pltpu.CompilerParams(
    dimension_semantics=("parallel",),
    vmem_limit_bytes=32 * 1024 * 1024,
)


# ----------------------------- Pallas kernel ------------------------------- #

def _activation_kernel(scale_ref, accum_ref, out_ref):
    # get_activation(): spikes_accum * scale, with scale = (v_th - v_r)/(t*dt)
    # precomputed once in the wrapper and passed as one SMEM scalar.
    out_ref[...] = accum_ref[...].astype(jnp.float32) * scale_ref[0]


# ------------------------------ glue helpers ------------------------------- #

def _pick_block_rows(rows):
    """Sublane-aligned block rows: >= 2 grid steps when possible (v7x megacore),
    capped so the double-buffered pipeline footprint stays well inside VMEM."""
    half = pl.cdiv(rows, 2)
    target = pl.cdiv(half, _SUBLANE) * _SUBLANE
    return max(_SUBLANE, min(_MAX_BLOCK_ROWS, target))


def _activation_impl(spikes_accum, v_th, v_r, t, dt):
    orig_shape = spikes_accum.shape
    n = spikes_accum.size

    # scale = (v_th - v_r) / (t * dt), computed once (int * f32 -> f32, same
    # promotion as torch).  No t == 0 guard, same as the reference.
    t_f = jnp.asarray(t).astype(jnp.float32)
    scale = ((v_th - v_r) / (t_f * dt)).astype(jnp.float32).reshape(1)

    # Lane-dense (rows, 128) slab: pad only to a multiple of 128 (skipped when
    # already divisible); the ragged last grid block is handled by Pallas.
    rows = pl.cdiv(n, _LANE)
    pad = rows * _LANE - n
    flat = spikes_accum.reshape(-1)
    if pad:
        flat = jnp.pad(flat, (0, pad))
    slab = flat.reshape(rows, _LANE)

    block_rows = _pick_block_rows(rows)
    grid = (pl.cdiv(rows, block_rows),)

    out = pl.pallas_call(
        _activation_kernel,
        out_shape=jax.ShapeDtypeStruct((rows, _LANE), jnp.float32),
        grid=grid,
        in_specs=[
            pl.BlockSpec(memory_space=pltpu.SMEM),               # scalar scale
            pl.BlockSpec((block_rows, _LANE), lambda i: (i, 0)),
        ],
        out_specs=pl.BlockSpec((block_rows, _LANE), lambda i: (i, 0)),
        compiler_params=_COMPILER_PARAMS,
    )(scale, slab)

    out = out.reshape(-1)
    if pad:
        out = out[:n]
    return out.reshape(orig_shape)


# jit so the reshape/pad/slice plumbing fuses with the pallas_call instead of
# running as separate eager full-array HBM passes.
_activation_jit = jax.jit(_activation_impl)


# --------------------------------- module ----------------------------------- #

class SpikingNeuron:
    """JAX/Pallas port of spieks.neurons.SpikingNeuron (state held functionally)."""

    def __init__(self, dt=0.001, v_th=1.0, v_r=0.0):
        self.dt = jnp.float32(dt)
        self.v_th = jnp.float32(v_th)
        self.v_r = jnp.float32(v_r)
        self.learning_rules = []      # empty in the base class
        self.initialized = False

    def setup(self, x):
        self.initialized = True
        self.v = jnp.zeros(x.shape, dtype=jnp.float32)
        self.t = 0
        self.spikes = jnp.zeros(x.shape, dtype=jnp.bool_)
        self.spikes_accum = jnp.zeros(x.shape, dtype=jnp.int32)

    def reset(self):
        self.initialized = False

    def forward(self, x):
        if not self.initialized:
            self.setup(x)
        self.t = self.t + 1
        # learning_rules is empty in the base class -> nothing to run.
        # The base class never reads x and never mutates `spikes`, so the
        # fastest forward() is returning the stored bool buffer directly:
        # no identity-copy kernel, no dtype conversion, zero HBM traffic.
        # TODO(synk): subclasses with integrate-and-fire dynamics should fuse
        # the v update + threshold + spike/accum writes into a single Pallas
        # kernel here (one HBM pass over x/v/spikes/spikes_accum).
        return self.spikes

    def get_activation(self):
        return _activation_jit(self.spikes_accum, self.v_th, self.v_r,
                               self.t, self.dt)


# --------------------------------- demo ------------------------------------ #

if __name__ == "__main__":
    key = jax.random.PRNGKey(0)
    # NCHW, small shapes: batch=2, channels=4, spatial=16x16 -> 2048 elems
    x = jax.random.normal(key, (2, 4, 16, 16), dtype=jnp.float32)

    neuron = SpikingNeuron(dt=0.001, v_th=1.0, v_r=0.0)

    spikes = jax.block_until_ready(neuron.forward(x))
    assert spikes.shape == x.shape and spikes.dtype == jnp.bool_
    assert not bool(jnp.any(spikes))            # base class: all-zero spikes
    assert neuron.t == 1

    act = jax.block_until_ready(neuron.get_activation())
    assert act.shape == x.shape and act.dtype == jnp.float32
    assert float(jnp.abs(act).max()) == 0.0     # accum is zero -> activation zero

    # Non-trivial check of the Pallas activation kernel against pure JAX.
    neuron.spikes_accum = jax.random.randint(
        jax.random.PRNGKey(1), x.shape, 0, 100, dtype=jnp.int32)
    neuron.t = 7
    act2 = jax.block_until_ready(neuron.get_activation())
    ref = neuron.spikes_accum.astype(jnp.float32) * (
        (neuron.v_th - neuron.v_r) / (jnp.float32(neuron.t) * neuron.dt))
    assert act2.shape == x.shape
    assert bool(jnp.allclose(act2, ref, rtol=1e-5, atol=1e-3))

    print("KERNEL_OK")
</pallas_src>

<mosaic_0001>
module attributes {stable_mosaic.version = 11 : i64} {
  func.func @_activation_kernel(%arg0: i32, %arg1: memref<1xf32, #tpu.memory_space<smem>>, %arg2: memref<8x128xi32, #tpu.memory_space<vmem>>, %arg3: memref<8x128xf32, #tpu.memory_space<vmem>>) attributes {dimension_semantics = [#tpu.dimension_semantics<parallel>], iteration_bounds = array<i64: 2>, scalar_prefetch = 0 : i64, scratch_operands = 0 : i64, tpu.core_type = #tpu.core_type<tc>, window_params = [{transform_indices = @transform_0, window_bounds = array<i64: 1>}, {transform_indices = @transform_1, window_bounds = array<i64: 8, 128>}, {transform_indices = @transform_2, window_bounds = array<i64: 8, 128>}]} {
    %c0 = arith.constant 0 : index
    %c0_0 = arith.constant 0 : index
    %0 = vector.load %arg2[%c0, %c0_0] : memref<8x128xi32, #tpu.memory_space<vmem>>, vector<8x128xi32>
    %1 = arith.sitofp %0 : vector<8x128xi32> to vector<8x128xf32>
    %c0_1 = arith.constant 0 : index
    %2 = memref.load %arg1[%c0_1] : memref<1xf32, #tpu.memory_space<smem>>
    %3 = vector.broadcast %2 : f32 to vector<8x128xf32>
    %4 = arith.mulf %1, %3 : vector<8x128xf32>
    %c0_2 = arith.constant 0 : index
    %c0_3 = arith.constant 0 : index
    %5 = vector.load %arg3[%c0_2, %c0_3] : memref<8x128xf32, #tpu.memory_space<vmem>>, vector<8x128xf32>
    tpu.vector_store %arg3[%c0_2, %c0_3], %4 {strides = array<i32>} : memref<8x128xf32, #tpu.memory_space<vmem>>, vector<8x128xf32>,
    return
  }
  func.func @transform_0(%arg0: i32) -> i32 {
    %c0_i32 = arith.constant 0 : i32
    %c0_i32_0 = arith.constant 0 : i32
    return %c0_i32 : i32
  }
  func.func @transform_1(%arg0: i32) -> (i32, i32) {
    %c0_i32 = arith.constant 0 : i32
    %c0_i32_0 = arith.constant 0 : i32
    return %arg0, %c0_i32 : i32, i32
  }
  func.func @transform_2(%arg0: i32) -> (i32, i32) {
    %c0_i32 = arith.constant 0 : i32
    %c0_i32_0 = arith.constant 0 : i32
    return %arg0, %c0_i32 : i32, i32
  }
}

</mosaic_0001>

<bundles_post_ra>
// kernel: _activation_impl.1
= control target key start
LH: loop header
LB: loop body
LE: loop exit
PB: predicated region body
PF: predicated region fallthrough
CT: control target
= control target key end

     0   :  { %s220_s11 = smov 0   ;;  %s248_s0 = inlined_call_operand.<no memory space> [shape: f32[1], index: 0, kind: input, shape index: {}]   ;;  %s249_s1 = inlined_call_operand.vmem [shape: s32[16,128], index: 1, kind: input, shape index: {}]   ;;  %s250_s2 = inlined_call_operand.vmem [shape: f32[16,128], index: 2, kind: output, shape index: {}]  }
   0x1   :  { %7 = sst [smem:[#allocation2]] %s248_s0 }
   0x2 LB: > { %s199_s12 = sadd.s32 4294967295, %s222_s11   ;;  %p203_p0 = scmp.ge.s32.totalorder %s222_s11, 1  ;;  %s222_s11 = sphi %s220_s11, %s13_s11  }
   0x3   : > { %p112_p1 = scmp.lt.s32.totalorder %s222_s11, 3 }
   0x5   : > { %p113_p2 = pnand %p203_p0, %p112_p1 }
   0x6   : > { %p132_p3 = scmp.lt.s32.totalorder (!%p113_p2), %s199_s12, 1  ;;  %s142_s13 = sld [smem:[#allocation2]] (!%p113_p2) }
   0x7   : > { %116 = sbr.rel (%p113_p2) target bundleno = 23 (0x17), region = 28 }
   0xc   : > { %v143_v1 = vstv (!%p113_p2), %s142_s13 }
   0xe   : > { %s252_s12 = smov (!%p132_p3, %s199_s12), 1 }
   0xf   : > { %s204_s14 = sshll.u32 %s252_s12, 3 }
  0x10   : > { %s135_s17 = scalar_lea.vmem %s249_s1, %s204_s14  ;;  %s139_s19 = scalar_lea.vmem %s250_s2, %s204_s14 }
  0x11   : > { %v140_v0 = vld [vmem:[%s135_s17] sm:$0xff] }
  0x12   : > { %v141_v2 = vcvt.s32.f32 %v140_v0 }
  0x14   : > { %v144_v3 = vmul.f32 %v143_v1, %v141_v2 }
  0x16   : > { %145 = vst [vmem:[%s139_s19] sm:$0xff] %v144_v3 }
  0x17 PF: > { %s13_s11 = sadd.s32 1, %s222_s11  }
  0x18   : > { %p10_p4 = scmp.ge.s32.totalorder %s13_s11, 4  }
  0x1a   :  { %12 = sbr.rel (!%p10_p4) target bundleno = 2 (0x2), region = 58 }

</bundles_post_ra>
